<compile_context>
chip_gen: v5e
topology: v5e:2x2
jax: 0.10.0
libtpu: 0.0.40
codegen_flags: <defaults>
</compile_context>

<pallas_src>
import functools

import jax
import jax.numpy as jnp
from jax.experimental import pallas as pl
from jax.experimental.pallas import tpu as pltpu

LANES = 128
SUBLANES = 8
MAX_TILE_ROWS = 2048   # 2048 x 128 f32 = 1 MiB per input block
NUM_CORES = 2          # leading "parallel" grid axis (v7x megacore); cheap elsewhere


def _round_up(a, b):
    return ((a + b - 1) // b) * b


def _cdiv(a, b):
    return (a + b - 1) // b


def _bce_sum_kernel(x_ref, y_ref, o_ref, acc_ref, *, n, tile_rows, blocks_per_core):
    c = pl.program_id(0)   # core / partition index ("parallel")
    i = pl.program_id(1)   # block index within partition ("arbitrary", reduction)

    @pl.when(i == 0)
    def _():
        acc_ref[...] = jnp.zeros_like(acc_ref)

    x = x_ref[...].astype(jnp.float32)
    y = y_ref[...].astype(jnp.float32)

    # Numerically stable BCE-with-logits (same as PyTorch's implementation).
    loss = jnp.maximum(x, 0.0) - x * y + jnp.log1p(jnp.exp(-jnp.abs(x)))

    # In-kernel validity mask: zero out elements past the real length n
    # (padding must not contribute: BCE(0, 0) = log 2, not 0).
    row_off = (c * blocks_per_core + i) * tile_rows
    row_ids = jax.lax.broadcasted_iota(jnp.int32, (tile_rows, LANES), 0)
    lane_ids = jax.lax.broadcasted_iota(jnp.int32, (tile_rows, LANES), 1)
    flat_idx = (row_off + row_ids) * LANES + lane_ids
    loss = jnp.where(flat_idx < n, loss, 0.0)

    # Vreg-shaped partial sums (VPU adds only); rows group cleanly into
    # (tile_rows // 8, 8, 128) vreg tiles so no cross-lane work per step.
    acc_ref[...] += loss.reshape(tile_rows // SUBLANES, SUBLANES, LANES).sum(axis=0)

    @pl.when(i == blocks_per_core - 1)
    def _():
        o_ref[...] = acc_ref[...]


def bce_with_logits_loss_2d(logits, targets, reduction="mean"):
    """Pallas implementation of BCEWithLogitsLoss2d.forward (reduction='mean')."""
    assert reduction == "mean", "only reduction='mean' implemented"
    # TODO(synk): reduction='none'/'sum' and pos_weight/weight kwargs not implemented.

    x = logits.reshape(-1)
    y = targets.reshape(-1)
    n = x.shape[0]

    rows_needed = _cdiv(n, LANES)
    rows_per_core = _cdiv(rows_needed, NUM_CORES)
    tile_rows = min(MAX_TILE_ROWS, _round_up(rows_per_core, SUBLANES))
    blocks_per_core = _cdiv(rows_per_core, tile_rows)
    rows_padded = NUM_CORES * blocks_per_core * tile_rows
    n_pad = rows_padded * LANES

    # Keep native dtype (kernel upcasts to f32); jnp.pad avoids the
    # zeros()+scatter full-array pass of the previous version.
    x2 = jnp.pad(x, (0, n_pad - n)).reshape(rows_padded, LANES)
    y2 = jnp.pad(y, (0, n_pad - n)).reshape(rows_padded, LANES)

    in_spec = pl.BlockSpec(
        (tile_rows, LANES), lambda c, i: (c * blocks_per_core + i, 0)
    )

    kernel = functools.partial(
        _bce_sum_kernel, n=n, tile_rows=tile_rows, blocks_per_core=blocks_per_core
    )

    partials = pl.pallas_call(
        kernel,
        out_shape=jax.ShapeDtypeStruct((NUM_CORES * SUBLANES, LANES), jnp.float32),
        grid_spec=pltpu.PrefetchScalarGridSpec(
            num_scalar_prefetch=0,
            grid=(NUM_CORES, blocks_per_core),
            in_specs=[in_spec, in_spec],
            out_specs=pl.BlockSpec((SUBLANES, LANES), lambda c, i: (c, 0)),
            scratch_shapes=[pltpu.VMEM((SUBLANES, LANES), jnp.float32)],
        ),
        compiler_params=pltpu.CompilerParams(
            dimension_semantics=("parallel", "arbitrary"),
        ),
    )(x2, y2)

    # Single cross-lane reduce + mean, once, outside the hot loop.
    return jnp.sum(partials) / jnp.float32(n)


if __name__ == "__main__":
    key = jax.random.PRNGKey(0)
    k1, k2 = jax.random.split(key)
    # Small NCHW-like shapes consistent with a 2d segmentation loss.
    logits = jax.random.normal(k1, (2, 4, 16, 16), dtype=jnp.float32)
    targets = (jax.random.uniform(k2, (2, 4, 16, 16)) > 0.5).astype(jnp.float32)

    loss = bce_with_logits_loss_2d(logits, targets)
    jax.block_until_ready(loss)

    # Sanity check against a pure-JAX reference.
    xf = logits.reshape(-1)
    yf = targets.reshape(-1)
    ref = jnp.mean(jnp.maximum(xf, 0.0) - xf * yf + jnp.log1p(jnp.exp(-jnp.abs(xf))))
    assert jnp.allclose(loss, ref, rtol=1e-5, atol=1e-6), (loss, ref)

    print("KERNEL_OK")
</pallas_src>

<mosaic_0001>
module attributes {stable_mosaic.version = 11 : i64} {
  func.func @_bce_sum_kernel(%arg0: i32, %arg1: i32, %arg2: memref<8x128xf32, #tpu.memory_space<vmem>>, %arg3: memref<8x128xf32, #tpu.memory_space<vmem>>, %arg4: memref<8x128xf32, #tpu.memory_space<vmem>>, %arg5: memref<8x128xf32, #tpu.memory_space<vmem>>) attributes {dimension_semantics = [#tpu.dimension_semantics<parallel>, #tpu.dimension_semantics<arbitrary>], iteration_bounds = array<i64: 2, 1>, scalar_prefetch = 0 : i64, scratch_operands = 1 : i64, tpu.core_type = #tpu.core_type<tc>, window_params = [{transform_indices = @transform_0, window_bounds = array<i64: 8, 128>}, {transform_indices = @transform_1, window_bounds = array<i64: 8, 128>}, {transform_indices = @transform_2, window_bounds = array<i64: 8, 128>}]} {
    %c0_i32 = arith.constant 0 : i32
    %0 = arith.cmpi eq, %arg1, %c0_i32 : i32
    %1 = arith.extui %0 : i1 to i32
    %c0_i32_0 = arith.constant 0 : i32
    %2 = arith.cmpi ne, %1, %c0_i32_0 : i32
    scf.if %2 {
      %cst_13 = arith.constant 0.000000e+00 : f32
      %37 = vector.broadcast %cst_13 : f32 to vector<8x128xf32>
      %c0_14 = arith.constant 0 : index
      %c0_15 = arith.constant 0 : index
      %38 = vector.load %arg5[%c0_14, %c0_15] : memref<8x128xf32, #tpu.memory_space<vmem>>, vector<8x128xf32>
      tpu.vector_store %arg5[%c0_14, %c0_15], %37 {strides = array<i32>} : memref<8x128xf32, #tpu.memory_space<vmem>>, vector<8x128xf32>,
    } else {
    }
    %c0 = arith.constant 0 : index
    %c0_1 = arith.constant 0 : index
    %3 = vector.load %arg2[%c0, %c0_1] : memref<8x128xf32, #tpu.memory_space<vmem>>, vector<8x128xf32>
    %c0_2 = arith.constant 0 : index
    %c0_3 = arith.constant 0 : index
    %4 = vector.load %arg3[%c0_2, %c0_3] : memref<8x128xf32, #tpu.memory_space<vmem>>, vector<8x128xf32>
    %cst = arith.constant 0.000000e+00 : f32
    %5 = vector.broadcast %cst : f32 to vector<8x128xf32>
    %6 = arith.maximumf %3, %5 : vector<8x128xf32>
    %7 = arith.mulf %3, %4 : vector<8x128xf32>
    %8 = arith.subf %6, %7 : vector<8x128xf32>
    %9 = math.absf %3 : vector<8x128xf32>
    %cst_4 = arith.constant 0.000000e+00 : f32
    %10 = vector.broadcast %cst_4 : f32 to vector<8x128xf32>
    %11 = arith.subf %10, %9 : vector<8x128xf32>
    %12 = math.exp %11 : vector<8x128xf32>
    %13 = math.log1p %12 : vector<8x128xf32>
    %14 = arith.addf %8, %13 : vector<8x128xf32>
    %c1_i32 = arith.constant 1 : i32
    %15 = arith.muli %arg0, %c1_i32 : i32
    %16 = arith.addi %15, %arg1 : i32
    %c8_i32 = arith.constant 8 : i32
    %17 = arith.muli %16, %c8_i32 : i32
    %18 = tpu.iota {dimensions = array<i32: 0>} : vector<8x128xi32>
    %19 = tpu.iota {dimensions = array<i32: 1>} : vector<8x128xi32>
    %20 = vector.broadcast %17 : i32 to vector<8x128xi32>
    %21 = arith.addi %20, %18 : vector<8x128xi32>
    %c128_i32 = arith.constant 128 : i32
    %22 = vector.broadcast %c128_i32 : i32 to vector<8x128xi32>
    %23 = arith.muli %21, %22 : vector<8x128xi32>
    %24 = arith.addi %23, %19 : vector<8x128xi32>
    %c2048_i32 = arith.constant 2048 : i32
    %25 = vector.broadcast %c2048_i32 : i32 to vector<8x128xi32>
    %26 = arith.cmpi slt, %24, %25 : vector<8x128xi32>
    %cst_5 = arith.constant 0.000000e+00 : f32
    %27 = vector.broadcast %cst_5 : f32 to vector<8x128xf32>
    %28 = arith.select %26, %14, %27 : vector<8x128xi1>, vector<8x128xf32>
    %c0_6 = arith.constant 0 : index
    %c0_7 = arith.constant 0 : index
    %29 = vector.load %arg5[%c0_6, %c0_7] : memref<8x128xf32, #tpu.memory_space<vmem>>, vector<8x128xf32>
    %30 = vector.shape_cast %28 : vector<8x128xf32> to vector<1x8x128xf32>
    %cst_8 = arith.constant dense<0.000000e+00> : vector<8x128xf32>
    %31 = vector.multi_reduction <add>, %30, %cst_8 [0] : vector<1x8x128xf32> to vector<8x128xf32>
    %32 = arith.addf %29, %31 : vector<8x128xf32>
    %c0_9 = arith.constant 0 : index
    %c0_10 = arith.constant 0 : index
    %33 = vector.load %arg5[%c0_9, %c0_10] : memref<8x128xf32, #tpu.memory_space<vmem>>, vector<8x128xf32>
    tpu.vector_store %arg5[%c0_9, %c0_10], %32 {strides = array<i32>} : memref<8x128xf32, #tpu.memory_space<vmem>>, vector<8x128xf32>,
    %c0_i32_11 = arith.constant 0 : i32
    %34 = arith.cmpi eq, %arg1, %c0_i32_11 : i32
    %35 = arith.extui %34 : i1 to i32
    %c0_i32_12 = arith.constant 0 : i32
    %36 = arith.cmpi ne, %35, %c0_i32_12 : i32
    scf.if %36 {
      %c0_13 = arith.constant 0 : index
      %c0_14 = arith.constant 0 : index
      %37 = vector.load %arg5[%c0_13, %c0_14] : memref<8x128xf32, #tpu.memory_space<vmem>>, vector<8x128xf32>
      %c0_15 = arith.constant 0 : index
      %c0_16 = arith.constant 0 : index
      %38 = vector.load %arg4[%c0_15, %c0_16] : memref<8x128xf32, #tpu.memory_space<vmem>>, vector<8x128xf32>
      tpu.vector_store %arg4[%c0_15, %c0_16], %37 {strides = array<i32>} : memref<8x128xf32, #tpu.memory_space<vmem>>, vector<8x128xf32>,
    } else {
    }
    return
  }
  func.func @transform_0(%arg0: i32, %arg1: i32) -> (i32, i32) {
    %c1_i32 = arith.constant 1 : i32
    %0 = arith.muli %arg0, %c1_i32 : i32
    %1 = arith.addi %0, %arg1 : i32
    %c0_i32 = arith.constant 0 : i32
    %c0_i32_0 = arith.constant 0 : i32
    return %1, %c0_i32 : i32, i32
  }
  func.func @transform_1(%arg0: i32, %arg1: i32) -> (i32, i32) {
    %c1_i32 = arith.constant 1 : i32
    %0 = arith.muli %arg0, %c1_i32 : i32
    %1 = arith.addi %0, %arg1 : i32
    %c0_i32 = arith.constant 0 : i32
    %c0_i32_0 = arith.constant 0 : i32
    return %1, %c0_i32 : i32, i32
  }
  func.func @transform_2(%arg0: i32, %arg1: i32) -> (i32, i32) {
    %c0_i32 = arith.constant 0 : i32
    %c0_i32_0 = arith.constant 0 : i32
    return %arg0, %c0_i32 : i32, i32
  }
}

</mosaic_0001>

<bundles_post_ra>
// kernel: tpu_custom_call.1
= control target key start
LH: loop header
LB: loop body
LE: loop exit
PB: predicated region body
PF: predicated region fallthrough
CT: control target
= control target key end

     0   :  { %7 = vsyncpa [#allocation4], 0  ;;  %s768_s0 = inlined_call_operand.hbm [shape: f32[16,128], index: 0, kind: input, shape index: {}]   ;;  %s769_s1 = inlined_call_operand.hbm [shape: f32[16,128], index: 1, kind: input, shape index: {}]   ;;  %s770_s2 = inlined_call_operand.hbm [shape: f32[16,128], index: 2, kind: output, shape index: {}]  }
   0x1   :  { %9 = vsyncpa [#allocation4 + $0x1], 0 }
   0x2   :  { %10 = vsyncpa [#allocation7], 0 }
   0x3   :  { %12 = vsyncpa [#allocation7 + $0x1], 0 }
   0x4   :  { %13 = vsyncpa [#allocation5], 0 }
   0x5   :  { %15 = vsyncpa [#allocation5 + $0x1], 0  ;;  %s635_s9 = smov 0   ;;  %s637_s10 = smov 0  }
   0x6   :  { %s639_s11 = smov 0   ;;  %s641_s12 = smov 0  }
   0x7   :  { %s643_s13 = smov 0   ;;  %s645_s14 = smov 0  }
   0x8 LB: > { %s384_s15 = sadd.s32 4294967295, %s618_s14   ;;  %s385_s16 = sadd.s32 4294967294, %s618_s14   ;;  %s618_s14 = sphi %s645_s14, %s21_s14   ;;  %s614_s13 = sphi %s643_s13, %s779_s13   ;;  %s610_s12 = sphi %s641_s12, %s778_s12   ;;  %s606_s11 = sphi %s639_s11, %s777_s11   ;;  %s602_s10 = sphi %s637_s10, %s776_s10   ;;  %s598_s9 = sphi %s635_s9, %s775_s9  }
   0x9   : > { %s33_s17 = sadd.s32 1, %s614_s13  ;;  %s42_s18 = sadd.s32 1, %s606_s11 }
   0xa   : > { %p35_p0 = scmp.ge.s32.totalorder %s33_s17, 2  ;;  %p49_p1 = scmp.ne.s32.totalorder %s606_s11, %s602_s10 }
   0xb   : > { %p50_p2 = scmp.eq.s32.totalorder %s618_s14, 0  ;;  %p55_p3 = scmp.ne.s32.totalorder %s602_s10, %s598_s9 }
   0xc   : > { %s781_s17 = smov (%p35_p0, %s33_s17), 0  ;;  %p56_p5 = scmp.eq.s32.totalorder %s384_s15, 0 }
   0xd   : > { %p676_p4 = por %p50_p2, %p49_p1  ;;  %s39_s20 = ssub.s32 %s614_s13, %s781_s17 }
   0xe   : > { %p107_p6 = scmp.eq.s32.totalorder %s384_s15, 1  ;;  %p40_p7 = scmp.eq.s32.totalorder %s39_s20, 0 }
   0xf   : > { %p682_p8 = por %p56_p5, %p55_p3  ;;  %p113_p10 = scmp.eq.s32.totalorder %s385_s16, 1 }
  0x10   : > { %p686_p9 = por %p107_p6, %p49_p1  ;;  %p387_p12 = scmp.ge.s32.totalorder %s618_s14, 2 }
  0x11   : > { %s691_s23 = scalar_select %p40_p7, %s606_s11, %s42_s18  }
  0x12   : > { %p693_p11 = por %p113_p10, %p55_p3  ;;  %p418_p13 = scmp.lt.s32.totalorder %s618_s14, 2 }
  0x13   : > { %s133_s25 = sand.u32 1, %s606_s11   ;;  %s389_s27 = sshll.u32 %s614_s13, 3 }
  0x14   : > { %s388_s26 = sshll.u32 %s133_s25, 3  ;;  %s142_s30 = scalar_lea.hbm %s768_s0, %s389_s27 }
  0x15   : > { %s137_s3 = scalar_lea.vmem [#allocation3], %s388_s26  ;;  %s144_s5 = sshll.u32 %s142_s30, 4  ;;  %s145_s5 = int_to_ptr.hbm [resolvable:$true] %s144_s5 }
  0x16   : > { %s146_s4 = sshll.u32 %s137_s3, 4  ;;  %p408_p0 = pnand %p418_p13, %p676_p4  ;;  %s147_s4 = int_to_ptr.vmem [resolvable:$true] %s146_s4 }
  0x17   : > { %p392_p1 = scmp.ge.s32.totalorder %s618_s14, 1  ;;  %p171_p2 = scmp.lt.s32.totalorder %s618_s14, 3 }
  0x18   : > { %s134_s6 = scalar_lea.sflag [#allocation4], %s133_s25  ;;  %s162_s15 = scalar_lea.hbm %s769_s1, %s389_s27 }
  0x19   : > { %410 = dma.hbm_to_vmem [thread:$0]  (!%p408_p0), %s145_s5, 128, %s147_s4, %s134_s6  }
  0x1a   : > { %p172_p3 = pnand %p392_p1, %p171_p2  ;;  %s157_s16 = scalar_lea.vmem [#allocation6], %s388_s26 }
  0x1b   : > { %s166_s18 = sshll.u32 %s157_s16, 4  ;;  %s164_s20 = sshll.u32 %s162_s15, 4  ;;  %s167_s18 = int_to_ptr.vmem [resolvable:$true] %s166_s18  ;;  %s165_s20 = int_to_ptr.hbm [resolvable:$true] %s164_s20 }
  0x1c   : > { %s154_s28 = scalar_lea.sflag [#allocation7], %s133_s25  ;;  %175 = sbr.rel (%p172_p3) target bundleno = 68 (0x44), region = 28 }
  0x1d   : > { %413 = dma.hbm_to_vmem [thread:$0]  (!%p408_p0), %s165_s20, 128, %s167_s18, %s154_s28  }
  0x1e   : > { %s712_s19 = sand.u32 (!%p172_p3), 1, %s602_s10  }
  0x1f   : > { %s715_s29 = sshll.u32 (!%p172_p3), %s712_s19, 3  ;;  %s178_s30 = scalar_lea.sflag (!%p172_p3), [#allocation4], %s712_s19 }
  0x20   : > { %s181_s3 = scalar_lea.vmem (!%p172_p3), [#allocation3], %s715_s29 }
  0x21   : > { %585 = dma.done.wait (%p682_p8), %s178_s30, 128  }
  0x22   : > { %587 = vsyncadd (%p682_p8), %s178_s30, 4294967168  ;;  %s188_s25 = scalar_lea.sflag [#allocation7], %s712_s19  ;;  %s191_s26 = scalar_lea.vmem [#allocation6], %s715_s29 }
  0x23   : > { %589 = dma.done.wait (%p682_p8), %s188_s25, 128  }
  0x24   : > { %591 = vsyncadd (%p682_p8), %s188_s25, 4294967168  ;;  %v225_v0 = vld [vmem:[%s181_s3] sm:$0xff]  ;;  %v246_v4 = vlaneseq  ;;  %s396_s27 = sshll.u32 %s610_s12, 3  ;;  %v226_v11 = vld [vmem:[%s191_s26] sm:$0xff]  ;;  %s217_s5 = scalar_lea.vmem [#allocation8], %s715_s29 }
  0x25   : > { %v230_v1 = vand.u32 2147483647, %v225_v0  ;;  %v250_v6 = vstv %s396_s27  ;;  %v227_v15 = vmax.f32 %v225_v0, 0.0  ;;  %v228_v16 = vmul.f32 %v226_v11, %v225_v0  ;;  %s276_s12 = scalar_lea.hbm %s770_s2, %s396_s27  ;;  %s278_s6 = sshll.u32 %s217_s5, 4  ;;  %s279_s6 = int_to_ptr.vmem [resolvable:$true] %s278_s6 }
  0x26   : > { %v247_v5 = vshrl.u32 %v246_v4, 7  ;;  %v249_v13 = vand.u32 127, %v246_v4  ;;  %s280_s7 = sshll.u32 %s276_s12, 4  ;;  %s266_s8 = scalar_lea.sflag [#allocation5], %s712_s19  ;;  %s281_s7 = int_to_ptr.hbm [resolvable:$true] %s280_s7 }
  0x27   : > { %v231_v2 = vsub.f32 0.0, %v230_v1  ;;  %v229_v21 = vsub.f32 %v227_v15, %v228_v16  ;;  %s546_s15 = sshra.s32 %s281_s7, 4  ;;  %s552_s28 = scalar_lea.hbm %s770_s2, 16  ;;  %s547_s15 = int_to_ptr.hbm [resolvable:$true] %s546_s15 }
  0x28   : > { %v251_v8 = vadd.s32 %v250_v6, %v247_v5  ;;  %s548_s16 = scalar_lea.hbm %s547_s15, 8  ;;  %p553_p7 = scmp.lt.s32.totalorder %s547_s15, %s770_s2 }
  0x29   : > { %v232_v3 = vmul.f32 1.442695, %v231_v2  ;;  %p549_p4 = scmp.ne.s32.totalorder %s547_s15, %s548_s16  ;;  %p554_p8 = scmp.lt.s32.totalorder %s552_s28, %s548_s16 }
  0x2a   : > { %v252_v14 = vmul.u32 128, %v251_v8 }
  0x2b   : > { %468 = vpow2.f32 %v232_v3  ;;  %p550_p5 = pnand %p549_p4, %p686_p9  ;;  %p555_p10 = por %p554_p8, %p553_p7 }
  0x2c   : > { %v253_v19 = vadd.s32 %v252_v14, %v249_v13 }
  0x2d   : > { %p551_p6 = pneg %p550_p5 }
  0x2e   : > { %vm254_vm1 = vcmp.lt.s32.totalorder %v253_v19, 2048 }
  0x2f   : > { %p556_p13 = pnand %p555_p10, %p551_p6 }
  0x31   : > { %v469_v7 = vpop.eup %468 }
  0x32   : > { %v234_v9 = vadd.f32 1.0, %v469_v7  ;;  %v237_v10 = vmul.f32 -0.5, %v469_v7  ;;  %v240_v17 = vand.u32 2147483647, %v469_v7 }
  0x34   : > { %470 = vlog2.f32 %v234_v9  ;;  %v238_v12 = vadd.f32 1.0, %v237_v10  ;;  %vm241_vm0 = vcmp.lt.f32.partialorder %v240_v17, 0.0004427343 }
  0x36   : > { %v239_v18 = vmul.f32 %v469_v7, %v238_v12 }
  0x3a   : > { %v471_v20 = vpop.eup %470 }
  0x3b   : > { %v236_v22 = vmul.f32 0.6931472, %v471_v20 }
  0x3d   : > { %v242_v23 = vsel %vm241_vm0, %v239_v18, %v236_v22 }
  0x3e   : > { %v243_v24 = vadd.f32 %v242_v23, %v229_v21 }
  0x40   : > { %v255_v25 = vsel %vm254_vm1, %v243_v24, 0.0 }
  0x41   : > { %264 = vst [vmem:[%s217_s5] sm:$0xff] %v255_v25 }
  0x42   : > { %559 = shalt.err (!%p556_p13)
}
  0x43   : > { %405 = dma.vmem_to_hbm [thread:$0]  (%p686_p9), %s279_s6, 128, %s281_s7, %s266_s8  }
  0x44 PF: > { %s292_s19 = sand.u32 1, %s598_s9   ;;  %p415_p0 = pnand %p387_p12, %p693_p11 }
  0x45   : > { %s293_s3 = scalar_lea.sflag [#allocation5], %s292_s19 }
  0x46   : > { %p416_p1 = pneg %p415_p0 }
  0x48   : > { %593 = dma.done.wait (%p416_p1), %s293_s3, 128  }
  0x49   : > { %595 = vsyncadd (%p416_p1), %s293_s3, 4294967168  ;;  %s21_s14 = sadd.s32 1, %s618_s14   ;;  %s775_s9 = smov %s602_s10 }
  0x4a   : > { %p18_p2 = scmp.ge.s32.totalorder %s21_s14, 4   ;;  %s776_s10 = smov %s606_s11 }
  0x4b   : > { %s777_s11 = smov %s691_s23  ;;  %s778_s12 = smov %s614_s13 }
  0x4c   : > { %s779_s13 = smov %s781_s17  ;;  %20 = sbr.rel (!%p18_p2) target bundleno = 8 (0x8), region = 94 }
  0x51   :  { %299 = vsyncpa [#allocation4], 1 }
  0x52   :  { %301 = vsyncpa [#allocation4 + $0x1], 1 }
  0x53   :  { %302 = vsyncpa [#allocation7], 1 }
  0x54   :  { %304 = vsyncpa [#allocation7 + $0x1], 1 }
  0x55   :  { %305 = vsyncpa [#allocation5], 1 }
  0x56   :  { %307 = vsyncpa [#allocation5 + $0x1], 1 }

</bundles_post_ra>
